<compile_context>
chip_gen: v7x
topology: tpu7x:2x2x1
jax: 0.10.0
libtpu: 0.0.40
codegen_flags: <defaults>
</compile_context>

<pallas_src>
import numpy as np
import jax
import jax.numpy as jnp
from jax import lax
from jax.experimental import pallas as pl
from jax.experimental.pallas import tpu as pltpu


_TILE_M = 16384  # rows per grid step (multiple of 128)


def _sigmoid(x):
    # exp goes to the EUP; full-precision reciprocal keeps the reference check tight.
    # (pl.reciprocal(..., approx=True) is available if ~1e-3 error were acceptable.)
    return pl.reciprocal(1.0 + jnp.exp(-x), approx=False)


def _mlp_kernel(x_ref, w1_ref, b1_ref, w2_ref, b2_ref, w3_ref, b3_ref, o_ref):
    # x_ref: (TILE_M, 8) raw input tile. Contract over the 8-feature axis with M on
    # lanes (same pattern as q @ k.T), so every activation is lane-dense (f, TILE_M).
    x = x_ref[...]
    h1 = lax.dot_general(
        w1_ref[...], x,                              # (6, 8) x (TILE_M, 8) -> (6, TILE_M)
        dimension_numbers=(((1,), (1,)), ((), ())),
        preferred_element_type=jnp.float32,
    ) + b1_ref[...]
    h1 = _sigmoid(h1)

    h2 = jnp.dot(w2_ref[...], h1, preferred_element_type=jnp.float32) + b2_ref[...]
    h2 = _sigmoid(h2)                                # (4, TILE_M)

    h3 = jnp.dot(w3_ref[...], h2, preferred_element_type=jnp.float32) + b3_ref[...]
    o_ref[...] = _sigmoid(h3).astype(o_ref.dtype)    # (1, TILE_M), unmasked lane-dense store


def _round_up(n, m):
    return (n + m - 1) // m * m


def mlp_forward(x, params, tile_m=_TILE_M):
    """x: array of shape [..., 8] (float32). Returns array of shape [..., 1]."""
    w1, b1, w2, b2, w3, b3 = params
    lead = x.shape[:-1]
    feat = x.shape[-1]
    m = int(np.prod(lead)) if lead else 1

    x2 = x.reshape(m, feat).astype(jnp.float32)

    # Tile the row axis: multiple of 128 lanes, padded so the grid divides evenly.
    tile = min(tile_m, _round_up(m, 128))
    m_pad = _round_up(m, tile)
    if m_pad != m:
        x2 = jnp.pad(x2, ((0, m_pad - m), (0, 0)))

    def _const(i):      # weights/biases: same block every step -> stay resident in VMEM
        return (0, 0)

    out = pl.pallas_call(
        _mlp_kernel,
        out_shape=jax.ShapeDtypeStruct((1, m_pad), jnp.float32),
        grid=(m_pad // tile,),
        in_specs=[
            pl.BlockSpec((tile, feat), lambda i: (i, 0)),   # streamed input rows
            pl.BlockSpec(w1.shape, _const),                 # (6, 8)
            pl.BlockSpec(b1.shape, _const),                 # (6, 1)
            pl.BlockSpec(w2.shape, _const),                 # (4, 6)
            pl.BlockSpec(b2.shape, _const),                 # (4, 1)
            pl.BlockSpec(w3.shape, _const),                 # (1, 4)
            pl.BlockSpec(b3.shape, _const),                 # (1, 1)
        ],
        out_specs=pl.BlockSpec((1, tile), lambda i: (0, i)),  # lane-dense output slab
        compiler_params=pltpu.CompilerParams(
            dimension_semantics=("parallel",),                # 2-TC sharding on v7x
            vmem_limit_bytes=32 * 1024 * 1024,
        ),
    )(x2, w1, b1, w2, b2, w3, b3)

    return out[0, :m].reshape(lead + (1,))


def init_params(key):
    """Deterministic init mimicking torch.nn.Linear (uniform +/- 1/sqrt(fan_in)).

    Weights are stored torch-style as (out_features, in_features); biases as
    (out_features, 1) so they broadcast along the lane (row) dimension in-kernel.
    """
    dims = [(8, 6), (6, 4), (4, 1)]
    params = []
    for fan_in, fan_out in dims:
        key, kw, kb = jax.random.split(key, 3)
        bound = 1.0 / np.sqrt(fan_in)
        w = jax.random.uniform(kw, (fan_out, fan_in), jnp.float32, -bound, bound)
        b = jax.random.uniform(kb, (fan_out, 1), jnp.float32, -bound, bound)
        params += [w, b]
    return tuple(params)


def reference_forward(x, params):
    """Pure-JAX reference for correctness checking."""
    w1, b1, w2, b2, w3, b3 = params
    h = jax.nn.sigmoid(x @ w1.T + b1[:, 0])
    h = jax.nn.sigmoid(h @ w2.T + b2[:, 0])
    return jax.nn.sigmoid(h @ w3.T + b3[:, 0])


if __name__ == "__main__":
    params = init_params(jax.random.PRNGKey(0))

    key = jax.random.PRNGKey(0)
    _, kx1, kx2 = jax.random.split(key, 3)

    # Multidimensional input with trailing feature dim 8, e.g. (2, 3, 4, 8).
    x1 = jax.random.normal(kx1, (2, 3, 4, 8), dtype=jnp.float32)
    out1 = jax.block_until_ready(mlp_forward(x1, params))
    assert out1.shape == (2, 3, 4, 1), out1.shape
    np.testing.assert_allclose(
        np.asarray(out1), np.asarray(reference_forward(x1, params)),
        rtol=1e-5, atol=1e-5)

    # Second shape exercising the ragged-tail padding path (M = 200, not /128).
    x2 = jax.random.normal(kx2, (4, 50, 8), dtype=jnp.float32)
    out2 = jax.block_until_ready(mlp_forward(x2, params))
    assert out2.shape == (4, 50, 1), out2.shape
    np.testing.assert_allclose(
        np.asarray(out2), np.asarray(reference_forward(x2, params)),
        rtol=1e-5, atol=1e-5)

    print("KERNEL_OK")
</pallas_src>

<mosaic_0001>
module attributes {stable_mosaic.version = 11 : i64} {
  func.func @_mlp_kernel(%arg0: i32, %arg1: memref<128x8xf32, #tpu.memory_space<vmem>>, %arg2: memref<6x8xf32, #tpu.memory_space<vmem>>, %arg3: memref<6x1xf32, #tpu.memory_space<vmem>>, %arg4: memref<4x6xf32, #tpu.memory_space<vmem>>, %arg5: memref<4x1xf32, #tpu.memory_space<vmem>>, %arg6: memref<1x4xf32, #tpu.memory_space<vmem>>, %arg7: memref<1x1xf32, #tpu.memory_space<vmem>>, %arg8: memref<1x128xf32, #tpu.memory_space<vmem>>) attributes {dimension_semantics = [#tpu.dimension_semantics<parallel>], iteration_bounds = array<i64: 1>, scalar_prefetch = 0 : i64, scratch_operands = 0 : i64, tpu.core_type = #tpu.core_type<tc>, window_params = [{transform_indices = @transform_0, window_bounds = array<i64: 128, 8>}, {pipeline_mode = #tpu.pipeline_mode<synchronous>, transform_indices = @transform_1, window_bounds = array<i64: 6, 8>}, {pipeline_mode = #tpu.pipeline_mode<synchronous>, transform_indices = @transform_2, window_bounds = array<i64: 6, 1>}, {pipeline_mode = #tpu.pipeline_mode<synchronous>, transform_indices = @transform_3, window_bounds = array<i64: 4, 6>}, {pipeline_mode = #tpu.pipeline_mode<synchronous>, transform_indices = @transform_4, window_bounds = array<i64: 4, 1>}, {pipeline_mode = #tpu.pipeline_mode<synchronous>, transform_indices = @transform_5, window_bounds = array<i64: 1, 4>}, {pipeline_mode = #tpu.pipeline_mode<synchronous>, transform_indices = @transform_6, window_bounds = array<i64: 1, 1>}, {transform_indices = @transform_7, window_bounds = array<i64: 1, 128>}]} {
    %c0 = arith.constant 0 : index
    %c0_0 = arith.constant 0 : index
    %0 = vector.load %arg1[%c0, %c0_0] : memref<128x8xf32, #tpu.memory_space<vmem>>, vector<128x8xf32>
    %c0_1 = arith.constant 0 : index
    %c0_2 = arith.constant 0 : index
    %1 = vector.load %arg2[%c0_1, %c0_2] : memref<6x8xf32, #tpu.memory_space<vmem>>, vector<6x8xf32>
    %cst = arith.constant dense<0.000000e+00> : vector<6x128xf32>
    %2 = tpu.matmul %1, %0, %cst {dimension_numbers = #tpu.dot_dimension_numbers<[1], [1], [0], [0], [0, 0, 1, 0], [], []>} : vector<6x8xf32>, vector<128x8xf32>, vector<6x128xf32> -> vector<6x128xf32>
    %c0_3 = arith.constant 0 : index
    %c0_4 = arith.constant 0 : index
    %3 = vector.load %arg3[%c0_3, %c0_4] : memref<6x1xf32, #tpu.memory_space<vmem>>, vector<6x1xf32>
    %4 = vector.broadcast %3 : vector<6x1xf32> to vector<6x128xf32>
    %5 = arith.addf %2, %4 : vector<6x128xf32>
    %cst_5 = arith.constant 0.000000e+00 : f32
    %6 = vector.broadcast %cst_5 : f32 to vector<6x128xf32>
    %7 = arith.subf %6, %5 : vector<6x128xf32>
    %8 = math.exp %7 : vector<6x128xf32>
    %cst_6 = arith.constant 1.000000e+00 : f32
    %9 = vector.broadcast %cst_6 : f32 to vector<6x128xf32>
    %10 = arith.addf %9, %8 : vector<6x128xf32>
    %11 = tpu.reciprocal %10 : vector<6x128xf32> -> vector<6x128xf32>
    %c0_7 = arith.constant 0 : index
    %c0_8 = arith.constant 0 : index
    %12 = vector.load %arg4[%c0_7, %c0_8] : memref<4x6xf32, #tpu.memory_space<vmem>>, vector<4x6xf32>
    %cst_9 = arith.constant dense<0.000000e+00> : vector<4x128xf32>
    %13 = tpu.matmul %12, %11, %cst_9 {dimension_numbers = #tpu.dot_dimension_numbers<[1], [0], [0], [1], [0, 0, 1, 1], [], []>} : vector<4x6xf32>, vector<6x128xf32>, vector<4x128xf32> -> vector<4x128xf32>
    %c0_10 = arith.constant 0 : index
    %c0_11 = arith.constant 0 : index
    %14 = vector.load %arg5[%c0_10, %c0_11] : memref<4x1xf32, #tpu.memory_space<vmem>>, vector<4x1xf32>
    %15 = vector.broadcast %14 : vector<4x1xf32> to vector<4x128xf32>
    %16 = arith.addf %13, %15 : vector<4x128xf32>
    %cst_12 = arith.constant 0.000000e+00 : f32
    %17 = vector.broadcast %cst_12 : f32 to vector<4x128xf32>
    %18 = arith.subf %17, %16 : vector<4x128xf32>
    %19 = math.exp %18 : vector<4x128xf32>
    %cst_13 = arith.constant 1.000000e+00 : f32
    %20 = vector.broadcast %cst_13 : f32 to vector<4x128xf32>
    %21 = arith.addf %20, %19 : vector<4x128xf32>
    %22 = tpu.reciprocal %21 : vector<4x128xf32> -> vector<4x128xf32>
    %c0_14 = arith.constant 0 : index
    %c0_15 = arith.constant 0 : index
    %23 = vector.load %arg6[%c0_14, %c0_15] : memref<1x4xf32, #tpu.memory_space<vmem>>, vector<1x4xf32>
    %cst_16 = arith.constant dense<0.000000e+00> : vector<1x128xf32>
    %24 = tpu.matmul %23, %22, %cst_16 {dimension_numbers = #tpu.dot_dimension_numbers<[1], [0], [0], [1], [0, 0, 1, 1], [], []>} : vector<1x4xf32>, vector<4x128xf32>, vector<1x128xf32> -> vector<1x128xf32>
    %c0_17 = arith.constant 0 : index
    %c0_18 = arith.constant 0 : index
    %25 = vector.load %arg7[%c0_17, %c0_18] : memref<1x1xf32, #tpu.memory_space<vmem>>, vector<1x1xf32>
    %26 = vector.broadcast %25 : vector<1x1xf32> to vector<1x128xf32>
    %27 = arith.addf %24, %26 : vector<1x128xf32>
    %cst_19 = arith.constant 0.000000e+00 : f32
    %28 = vector.broadcast %cst_19 : f32 to vector<1x128xf32>
    %29 = arith.subf %28, %27 : vector<1x128xf32>
    %30 = math.exp %29 : vector<1x128xf32>
    %cst_20 = arith.constant 1.000000e+00 : f32
    %31 = vector.broadcast %cst_20 : f32 to vector<1x128xf32>
    %32 = arith.addf %31, %30 : vector<1x128xf32>
    %33 = tpu.reciprocal %32 : vector<1x128xf32> -> vector<1x128xf32>
    %c0_21 = arith.constant 0 : index
    %c0_22 = arith.constant 0 : index
    %34 = vector.load %arg8[%c0_21, %c0_22] : memref<1x128xf32, #tpu.memory_space<vmem>>, vector<1x128xf32>
    tpu.vector_store %arg8[%c0_21, %c0_22], %33 {strides = array<i32>} : memref<1x128xf32, #tpu.memory_space<vmem>>, vector<1x128xf32>,
    return
  }
  func.func @transform_0(%arg0: i32) -> (i32, i32) {
    %c0_i32 = arith.constant 0 : i32
    %c0_i32_0 = arith.constant 0 : i32
    return %arg0, %c0_i32 : i32, i32
  }
  func.func @transform_1(%arg0: i32) -> (i32, i32) {
    %c0_i32 = arith.constant 0 : i32
    %c0_i32_0 = arith.constant 0 : i32
    %c0_i32_1 = arith.constant 0 : i32
    return %c0_i32, %c0_i32_0 : i32, i32
  }
  func.func @transform_2(%arg0: i32) -> (i32, i32) {
    %c0_i32 = arith.constant 0 : i32
    %c0_i32_0 = arith.constant 0 : i32
    %c0_i32_1 = arith.constant 0 : i32
    return %c0_i32, %c0_i32_0 : i32, i32
  }
  func.func @transform_3(%arg0: i32) -> (i32, i32) {
    %c0_i32 = arith.constant 0 : i32
    %c0_i32_0 = arith.constant 0 : i32
    %c0_i32_1 = arith.constant 0 : i32
    return %c0_i32, %c0_i32_0 : i32, i32
  }
  func.func @transform_4(%arg0: i32) -> (i32, i32) {
    %c0_i32 = arith.constant 0 : i32
    %c0_i32_0 = arith.constant 0 : i32
    %c0_i32_1 = arith.constant 0 : i32
    return %c0_i32, %c0_i32_0 : i32, i32
  }
  func.func @transform_5(%arg0: i32) -> (i32, i32) {
    %c0_i32 = arith.constant 0 : i32
    %c0_i32_0 = arith.constant 0 : i32
    %c0_i32_1 = arith.constant 0 : i32
    return %c0_i32, %c0_i32_0 : i32, i32
  }
  func.func @transform_6(%arg0: i32) -> (i32, i32) {
    %c0_i32 = arith.constant 0 : i32
    %c0_i32_0 = arith.constant 0 : i32
    %c0_i32_1 = arith.constant 0 : i32
    return %c0_i32, %c0_i32_0 : i32, i32
  }
  func.func @transform_7(%arg0: i32) -> (i32, i32) {
    %c0_i32 = arith.constant 0 : i32
    %c0_i32_0 = arith.constant 0 : i32
    return %c0_i32, %arg0 : i32, i32
  }
}

</mosaic_0001>

<bundles_post_ra>
// kernel: tpu_custom_call.1
= control target key start
LH: loop header
LB: loop body
LE: loop exit
PB: predicated region body
PF: predicated region fallthrough
CT: control target
= control target key end

     0   :  { %s694_s0 = inlined_call_operand.vmem [shape: f32[128,8], index: 0, kind: input, shape index: {}]   ;;  %s695_s1 = inlined_call_operand.vmem [shape: f32[6,8], index: 1, kind: input, shape index: {}]   ;;  %s696_s2 = inlined_call_operand.vmem [shape: f32[6,1], index: 2, kind: input, shape index: {}]   ;;  %s697_s3 = inlined_call_operand.vmem [shape: f32[4,6], index: 3, kind: input, shape index: {}]   ;;  %s698_s4 = inlined_call_operand.vmem [shape: f32[4,1], index: 4, kind: input, shape index: {}]   ;;  %s699_s5 = inlined_call_operand.vmem [shape: f32[1,4], index: 5, kind: input, shape index: {}]   ;;  %s700_s6 = inlined_call_operand.<no memory space> [shape: f32[1,1], index: 6, kind: input, shape index: {}]   ;;  %s701_s7 = inlined_call_operand.hbm [shape: f32[1,128], index: 7, kind: output, shape index: {}]  }
   0x1   :  { %v12_v0 = vstv %s700_s6 }
   0x2   :  { %13 = vst [vmem:[#allocation2] sm:$0x1] %v12_v0 }
   0x3   :  { %v29_v1 = vld [vmem:[%s694_s0] sm:$0xff]  ;;  %v30_v2 = vld [vmem:[%s694_s0 + $0x8] sm:$0xff]  ;;  %vm52_vm0 = vcmask 64512   ;;  %v540_v3 = vmov 0.0|0.0   ;;  %vm541_vm2 = vmmov 0   ;;  %v542_v6 = vmov 0.0  }
   0x4   :  { %465 = vmatprep.subr.bf16.mxu0 %v540_v3  ;;  %v466_v4 = vpack.c.bf16 %v30_v2, %v29_v1  ;;  %vm596_vm1 = vmpackc.low %vm52_vm0, %vm52_vm0  ;;  %452 = vmatprep.mubr.msk.f32.mxu0 %vm541_vm2, %v542_v6  ;;  %v543_v7 = vmov 0   ;;  %v31_v8 = vld [vmem:[%s694_s0 + $0x10] sm:$0xff]  ;;  %v32_v9 = vld [vmem:[%s694_s0 + $0x18] sm:$0xff] }
   0x5   :  { %502 = vset.pattern.permute.xlu0 %v543_v7  ;;  %455 = vmatprep.subr.mxu1 %v542_v6  ;;  %v46_v10 = vld [vmem:[%s696_s2] sm:$0x3f] }
   0x6   :  { %468 = vmatpush3.bf16.xpose.msk.msra.mxu0 %vm596_vm1, %v466_v4  ;;  %457 = vmatprep.mubr.msk.f32.mxu1 %vm541_vm2, %v542_v6 }
   0x7   :  { %469 = vmatprep.subr.bf16.mxu0 %v540_v3  ;;  %503 = vset.pattern.permute.xlu1 %v543_v7 }
   0x8   :  { %14 = vsyncpa [#allocation4], 0  ;;  %v470_v11 = vpack.c.bf16 %v32_v9, %v31_v8  ;;  %49 = vperm.xlu0 %502, %v46_v10   ;;  %v180_v12 = vld [vmem:[%s698_s4] sm:$0xf]  ;;  %v34_v14 = vld [vmem:[%s694_s0 + $0x28] sm:$0xff]  ;;  %vm190_vm3 = vcmask 1045504   ;;  %v276_v53 = vlaneseq }
   0x9   :  { %v33_v13 = vld [vmem:[%s694_s0 + $0x20] sm:$0xff]  ;;  %v35_v16 = vld [vmem:[%s694_s0 + $0x30] sm:$0xff]  ;;  %v36_v17 = vld [vmem:[%s694_s0 + $0x38] sm:$0xff]  ;;  %vm186_vm4 = vcmask 48128   ;;  %vm284_vm5 = vcmask 1043456   ;;  %vm280_vm6 = vcmask 31744  }
   0xa   :  { %v474_v15 = vpack.c.bf16 %v34_v14, %v33_v13  ;;  %v478_v18 = vpack.c.bf16 %v36_v17, %v35_v16  ;;  %v37_v19 = vld [vmem:[%s694_s0 + $0x40] sm:$0xff]  ;;  %v38_v20 = vld [vmem:[%s694_s0 + $0x48] sm:$0xff]  ;;  %v39_v22 = vld [vmem:[%s694_s0 + $0x50] sm:$0xff]  ;;  %v277_v54 = vshrl.u32 %v276_v53, 7  ;;  %s544_s15 = smov [#allocation3]  }
   0xb   :  { %v482_v21 = vpack.c.bf16 %v38_v20, %v37_v19  ;;  %v40_v23 = vld [vmem:[%s694_s0 + $0x58] sm:$0xff]  ;;  %v41_v25 = vld [vmem:[%s694_s0 + $0x60] sm:$0xff]  ;;  %v42_v26 = vld [vmem:[%s694_s0 + $0x68] sm:$0xff] }
   0xc   :  { %183 = vperm.xlu0 %502, %v180_v12   ;;  %v486_v24 = vpack.c.bf16 %v40_v23, %v39_v22  ;;  %v490_v27 = vpack.c.bf16 %v42_v26, %v41_v25  ;;  %v43_v28 = vld [vmem:[%s694_s0 + $0x70] sm:$0xff]  ;;  %v44_v29 = vld [vmem:[%s694_s0 + $0x78] sm:$0xff]  ;;  %v45_v31 = vld [vmem:[%s695_s1] sm:$0x3f]  ;;  %v278_v55 = vsub.s32 0, %v277_v54 }
   0xd   :  { %v494_v30 = vpack.c.bf16 %v44_v29, %v43_v28  ;;  %v179_v40 = vld [vmem:[%s697_s3] sm:$0xf] }
   0xe   :  { %472 = vmatpush3.bf16.xpose.msk.msra.mxu0 %vm596_vm1, %v470_v11  ;;  %v270_v42 = vld [vmem:[#allocation2] sm:$0x1] }
   0xf   :  { %473 = vmatprep.subr.bf16.mxu0 %v540_v3  ;;  %273 = vperm.xlu1 %503, %v270_v42   ;;  %v269_v51 = vld [vmem:[%s699_s5] sm:$0x1]  ;;  %s370_s5 = sshll.u32 %s544_s15, 4  ;;  %s371_s5 = int_to_ptr.vmem [resolvable:$true] %s370_s5 }
  0x10   :  { %s516_s16 = scalar_lea.vmem %s371_s5, 16  ;;  %s520_s17 = scalar_lea.vmem %s371_s5, 32 }
  0x11   :  { %p517_p0 = scmp.ne.s32.totalorder %s371_s5, %s516_s16  ;;  %p521_p1 = scmp.lt.s32.totalorder %s371_s5, %s371_s5 }
  0x12   :  { %p522_p2 = scmp.lt.s32.totalorder %s520_s17, %s516_s16 }
  0x14   :  { %p523_p3 = por %p522_p2, %p521_p1 }
  0x16   :  { %476 = vmatpush3.bf16.xpose.msk.msra.mxu0 %vm596_vm1, %v474_v15  ;;  %p524_p4 = pnand %p523_p3, %p517_p0 }
  0x17   :  { %477 = vmatprep.subr.bf16.mxu0 %v540_v3 }
  0x1e   :  { %480 = vmatpush3.bf16.xpose.msk.msra.mxu0 %vm596_vm1, %v478_v18 }
  0x1f   :  { %481 = vmatprep.subr.bf16.mxu0 %v540_v3 }
  0x26   :  { %484 = vmatpush3.bf16.xpose.msk.msra.mxu0 %vm596_vm1, %v482_v21 }
  0x27   :  { %485 = vmatprep.subr.bf16.mxu0 %v540_v3 }
  0x2e   :  { %488 = vmatpush3.bf16.xpose.msk.msra.mxu0 %vm596_vm1, %v486_v24 }
  0x2f   :  { %489 = vmatprep.subr.bf16.mxu0 %v540_v3 }
  0x36   :  { %492 = vmatpush3.bf16.xpose.msk.msra.mxu0 %vm596_vm1, %v490_v27 }
  0x37   :  { %493 = vmatprep.subr.bf16.mxu0 %v540_v3 }
  0x3e   :  { %496 = vmatpush3.bf16.xpose.msk.msra.mxu0 %vm596_vm1, %v494_v30 }
  0x45   :  { %453 = vmatmul.mubr.msk.f32.vlgmr.msra.gmra.mrb[0].mxu0 %vm52_vm0, %v45_v31 }
  0x87   :  { %v50_v32 = vpop.permute.xlu0 %49 }
  0x8b   :  { %v184_v43 = vpop.permute.xlu0 %183 }
  0x8e   :  { %v274_v56 = vpop.permute.xlu1 %273 }
  0x8f   :  { %v279_v57 = vrot.slane %v274_v56, %v278_v55 }
 0x118   :  { %v170_v33 = vpop.f32.mrb[0].mxu0 }
 0x119   :  { %v171_v34 = vadd.f32 %v170_v33, %v50_v32  ;;  %v454_v35 = vpop.f32.mrb[1].mxu0 }
 0x11b   :  { %v174_v36 = vsub.f32 0.0, %v171_v34 }
 0x11d   :  { %v175_v37 = vmul.f32 1.442695, %v174_v36 }
 0x11f   :  { %504 = vpow2.f32 %v175_v37 }
 0x129   :  { %v505_v38 = vpop.eup %504 }
 0x12a   :  { %v177_v39 = vadd.f32 1.0, %v505_v38 }
 0x12c   :  { %506 = vrcp.f32 %v177_v39 }
 0x136   :  { %v507_v41 = vpop.eup %506 }
 0x137   :  { %456 = vmatpush3.msk.msra.mxu1 %vm190_vm3, %v507_v41 }
 0x138   :  { %458 = vmatmul.mubr.msk.f32.vlgmr.msra.gmra.mrb[0].mxu1 %vm186_vm4, %v179_v40  ;;  %460 = vmatprep.subr.mxu1 %v542_v6 }
 0x139   :  { %462 = vmatprep.mubr.msk.f32.mxu1 %vm541_vm2, %v542_v6 }
 0x20b   :  { %v260_v44 = vpop.f32.mrb[0].mxu1 }
 0x20c   :  { %v261_v45 = vadd.f32 %v260_v44, %v184_v43  ;;  %v459_v46 = vpop.f32.mrb[1].mxu1 }
 0x20e   :  { %v264_v47 = vsub.f32 0.0, %v261_v45 }
 0x210   :  { %v265_v48 = vmul.f32 1.442695, %v264_v47 }
 0x212   :  { %508 = vpow2.f32 %v265_v48 }
 0x21c   :  { %v509_v49 = vpop.eup %508 }
 0x21d   :  { %v267_v50 = vadd.f32 1.0, %v509_v49 }
 0x21f   :  { %510 = vrcp.f32 %v267_v50 }
 0x229   :  { %v511_v52 = vpop.eup %510 }
 0x22a   :  { %461 = vmatpush3.msk.msra.mxu1 %vm284_vm5, %v511_v52 }
 0x22b   :  { %463 = vmatmul.mubr.msk.f32.vlgmr.msra.gmra.mrb[2].mxu1 %vm280_vm6, %v269_v51 }
 0x2fe   :  { %v354_v58 = vpop.f32.mrb[2].mxu1 }
 0x2ff   :  { %v355_v59 = vadd.f32 %v354_v58, %v279_v57  ;;  %v464_v60 = vpop.f32.mrb[3].mxu1 }
 0x301   :  { %v358_v61 = vsub.f32 0.0, %v355_v59 }
 0x303   :  { %v359_v62 = vmul.f32 1.442695, %v358_v61 }
 0x305   :  { %512 = vpow2.f32 %v359_v62 }
 0x30f   :  { %v513_v63 = vpop.eup %512 }
 0x310   :  { %v361_v0 = vadd.f32 1.0, %v513_v63 }
 0x312   :  { %514 = vrcp.f32 %v361_v0 }
 0x31c   :  { %v515_v1 = vpop.eup %514 }
 0x31d   :  { %363 = vst [vmem:[#allocation3] sm:$0x1] %v515_v1 }
 0x31e   :  { %527 = shalt.err (!%p524_p4)
}
 0x31f   :  { %s528_s18 = scalar_lea.hbm %s701_s7, 16 }
 0x320   :  { %p529_p5 = scmp.ne.s32.totalorder %s701_s7, %s528_s18  ;;  %p532_p6 = scmp.lt.u32.totalorder %s528_s18, %s701_s7 }
 0x322   :  { %p534_p7 = pnand %p532_p6, %p529_p5 }
 0x324   :  { %537 = shalt.err (!%p534_p7)
}
 0x325   :  { %373 = dma.vmem_to_hbm [thread:$0]  %s371_s5, 16, %s701_s7, [#allocation4]  }
 0x326   :  { %538 = dma.done.wait [#allocation4], 16  }
 0x327   :  { %539 = vsyncadd [#allocation4], 4294967280 }
 0x328   :  { %377 = vsyncpa [#allocation4], 1 }

</bundles_post_ra>
